<compile_context>
chip_gen: v5e
topology: v5e:2x2
jax: 0.10.0
libtpu: 0.0.40
codegen_flags: <defaults>
</compile_context>

<pallas_src>
import jax
import jax.numpy as jnp
from jax import lax
from jax.experimental import pallas as pl
from jax.experimental.pallas import tpu as pltpu


LANE = 128


def _round_up(v, m):
    return (v + m - 1) // m * m


def _mlp_kernel(x_ref, w1_ref, b1_ref, w2_ref, b2_ref, o_ref, acc_ref):
    """One (batch-tile, hidden-tile) step of Linear(W1,b1) -> ReLU -> Linear(W2,b2).

    Weights arrive pre-transposed to (K, N) layout and pre-padded to lane
    multiples, so both matmuls are plain (M,K)x(K,N) MXU feeds and the output
    store is lane-dense.  Grid axis 1 tiles the hidden (contraction) axis:
    partial ReLU(x @ W1_h + b1_h) @ W2_h terms are exact (ReLU is per hidden
    unit) and sum into the f32 accumulator scratch.
    """
    hk = pl.program_id(1)

    @pl.when(hk == 0)
    def _init():
        acc_ref[...] = jnp.zeros_like(acc_ref)

    dn = (((1,), (0,)), ((), ()))                       # (M,K) x (K,N): no in-kernel relayout
    x = x_ref[...].astype(w1_ref.dtype)                 # bf16 fast path if weights are bf16
    h = lax.dot_general(x, w1_ref[...], dn, preferred_element_type=jnp.float32)
    h = jnp.maximum(h + b1_ref[...], 0.0)               # f32 bias + ReLU on the VPU
    h = h.astype(w2_ref.dtype)                          # deliberate downcast feeding MXU #2
    acc_ref[...] += lax.dot_general(h, w2_ref[...], dn, preferred_element_type=jnp.float32)

    @pl.when(hk == pl.num_programs(1) - 1)
    def _finalize():
        o_ref[...] = (acc_ref[...] + b2_ref[...]).astype(o_ref.dtype)


def prepare_server_params(w1, b1, w2, b2, *, weight_dtype=jnp.float32):
    """One-time parameter prep (OUTSIDE the hot path).

    w1: (H, D_in)  PyTorch Linear weight layout
    b1: (H,)
    w2: (D_out, H)
    b2: (D_out,)

    Returns a dict with:
      * weights transposed to (in, out) / (K, N) MXU-feed layout,
      * hidden and output feature dims zero-padded to multiples of 128
        (lane-dense stores / aligned MXU tiles),
      * weights cast to `weight_dtype` (bf16 fast path on v6e/v7x); biases f32.
    """
    H, D_in = w1.shape
    D_out = w2.shape[0]
    H_pad = _round_up(H, LANE)
    D_out_pad = _round_up(D_out, LANE)

    w1_kn = jnp.zeros((D_in, H_pad), weight_dtype).at[:, :H].set(
        w1.T.astype(weight_dtype))
    b1_p = jnp.zeros((1, H_pad), jnp.float32).at[:, :H].set(
        b1.reshape(1, H).astype(jnp.float32))
    w2_kn = jnp.zeros((H_pad, D_out_pad), weight_dtype).at[:H, :D_out].set(
        w2.T.astype(weight_dtype))
    b2_p = jnp.zeros((1, D_out_pad), jnp.float32).at[:, :D_out].set(
        b2.reshape(1, D_out).astype(jnp.float32))
    return {"w1": w1_kn, "b1": b1_p, "w2": w2_kn, "b2": b2_p, "d_out": D_out}


def server_forward(x, params, *, hidden_block=None):
    """Pallas implementation of BaseServer.forward(x) == server_model(x).

    x       : (B, D_in) float32 or bfloat16 (bf16 activations are consumed
              natively; no wrapper-side cast is added).
    params  : output of prepare_server_params.
    returns : (B, D_out) in x.dtype.
    """
    w1, b1, w2, b2 = params["w1"], params["b1"], params["w2"], params["b2"]
    d_out = params["d_out"]
    B, D_in = x.shape
    assert w1.shape[0] == D_in
    H_pad = w1.shape[1]
    D_out_pad = w2.shape[1]
    out_dtype = x.dtype

    x_isz = x.dtype.itemsize
    w_isz = w1.dtype.itemsize
    o_isz = jnp.dtype(out_dtype).itemsize

    # ---- VMEM budget: size against the real chip (v5e/v6e 128 MiB, v7x 64 MiB) ----
    try:
        vmem_cap = int(pltpu.get_tpu_info().vmem_capacity_bytes)
    except Exception:  # noqa: BLE001 - conservative fallback (v7x per-TC VMEM)
        vmem_cap = 64 << 20
    budget = min(int(vmem_cap * 0.45), 48 << 20)

    param_bytes = (w1.size + w2.size) * w_isz + (b1.size + b2.size) * 4

    # ---- hidden (contraction) tiling: only if weights don't fit resident ----
    if hidden_block is not None:
        th = max(LANE, (int(hidden_block) // LANE) * LANE)
    elif param_bytes <= budget // 2:
        th = H_pad                                        # fully resident weights
    else:
        per_col = (D_in + D_out_pad) * w_isz + 4          # one hidden column of W1/W2 + b1
        th = max(LANE, ((budget // 2) // (2 * per_col)) // LANE * LANE)
    th = min(th, H_pad)
    while H_pad % th:          # the reduction axis must not have a masked boundary block
        th -= LANE
    grid_h = H_pad // th
    resident = grid_h == 1

    if resident:
        params_vmem = param_bytes                          # single-buffered (pl.Buffered(1))
    else:
        params_vmem = (2 * ((D_in * th + th * D_out_pad) * w_isz + th * 4)
                       + D_out_pad * 4)                    # double-buffered slices + b2

    # ---- batch tiling: fill remaining VMEM, multiples of 256 rows ----
    per_row = (2 * D_in * x_isz            # x tile, double-buffered
               + 2 * D_out_pad * o_isz     # out tile, double-buffered
               + D_out_pad * 4             # f32 accumulator scratch
               + th * (4 + w_isz))         # intermediate activation + its MXU-dtype copy
    tm_budget = max(256, ((budget - params_vmem) // per_row) // 256 * 256)
    tm_budget = min(tm_budget, 2048)
    if B <= 256:
        tm = B                             # one tile; block == full array dim (no masking)
    else:
        # keep >= 2 batch tiles so the "parallel" axis shards across v7x's two TCs
        tm = min(tm_budget, max(256, _round_up(pl.cdiv(B, 2), 256)))
    grid_m = pl.cdiv(B, tm)

    vmem_need = params_vmem + tm * per_row
    vmem_limit = int(min(max(vmem_need + (4 << 20), 16 << 20), int(vmem_cap * 0.75)))

    flops = 2 * B * (D_in * H_pad + H_pad * D_out_pad)
    bytes_accessed = (B * D_in * x_isz + B * D_out_pad * o_isz
                      + param_bytes * (1 if resident else grid_m))

    def _spec(shape, index_map, mode=None):
        if mode is None:
            return pl.BlockSpec(shape, index_map)
        return pl.BlockSpec(shape, index_map, pipeline_mode=mode)

    def launch(single_buffer_consts):
        const_mode = pl.Buffered(1) if single_buffer_consts else None
        res_mode = const_mode if resident else None
        return pl.pallas_call(
            _mlp_kernel,
            out_shape=jax.ShapeDtypeStruct((B, D_out_pad), out_dtype),
            grid=(grid_m, grid_h),
            in_specs=[
                _spec((tm, D_in), lambda i, h: (i, 0)),                 # x: streamed per batch tile
                _spec((D_in, th), lambda i, h: (0, h), res_mode),       # W1 (K,N)
                _spec((1, th), lambda i, h: (0, h), res_mode),          # b1
                _spec((th, D_out_pad), lambda i, h: (h, 0), res_mode),  # W2 (K,N)
                _spec((1, D_out_pad), lambda i, h: (0, 0), const_mode), # b2: always constant
            ],
            out_specs=pl.BlockSpec((tm, D_out_pad), lambda i, h: (i, 0)),
            scratch_shapes=[pltpu.VMEM((tm, D_out_pad), jnp.float32)],
            compiler_params=pltpu.CompilerParams(
                dimension_semantics=("parallel", "arbitrary"),
                vmem_limit_bytes=vmem_limit,
            ),
            cost_estimate=pl.CostEstimate(
                flops=flops, transcendentals=0, bytes_accessed=bytes_accessed),
        )(x, w1, b1, w2, b2)

    try:
        out = launch(True)        # single-buffer the grid-constant params (saves VMEM)
    except Exception:             # pragma: no cover - fallback if Buffered(1) unsupported
        out = launch(False)

    # Hot-path batch axis is untouched; only the (tiny) padded feature columns
    # are sliced off.
    return out if D_out_pad == d_out else out[:, :d_out]


def _init_linear(key, out_features, in_features):
    """Deterministic PyTorch-style Linear init: U(-1/sqrt(fan_in), +1/sqrt(fan_in))."""
    kw, kb = jax.random.split(key)
    bound = 1.0 / jnp.sqrt(jnp.float32(in_features))
    w = jax.random.uniform(kw, (out_features, in_features), jnp.float32,
                           minval=-bound, maxval=bound)
    b = jax.random.uniform(kb, (out_features,), jnp.float32,
                           minval=-bound, maxval=bound)
    return w, b


if __name__ == "__main__":
    # TODO(synk): BaseServer.action/update/distribute are abstract (no forward
    # compute); only forward() -> server_model(x) is implemented here.
    key = jax.random.PRNGKey(0)
    k_x, k_l1, k_l2, k_xb = jax.random.split(key, 4)

    B, D_IN, HID, D_OUT = 8, 32, 192, 16
    x = jax.random.normal(k_x, (B, D_IN), jnp.float32)
    w1, b1 = _init_linear(k_l1, HID, D_IN)
    w2, b2 = _init_linear(k_l2, D_OUT, HID)

    def ref_mlp(xs):
        return jnp.maximum(xs @ w1.T + b1, 0.0) @ w2.T + b2

    # --- exact f32 path: matches the PyTorch MLP semantics -------------------
    params_f32 = prepare_server_params(w1, b1, w2, b2)
    out = server_forward(x, params_f32)
    jax.block_until_ready(out)
    assert out.shape == (B, D_OUT)
    assert jnp.allclose(out, ref_mlp(x), atol=1e-5, rtol=1e-5)

    # --- larger batch: 2 batch tiles (megacore) + masked boundary block ------
    BB = 300
    xb = jax.random.normal(k_xb, (BB, D_IN), jnp.float32)
    out_b = server_forward(xb, params_f32)
    jax.block_until_ready(out_b)
    assert out_b.shape == (BB, D_OUT)
    assert jnp.allclose(out_b, ref_mlp(xb), atol=1e-5, rtol=1e-5)

    # --- bf16-weight fast path + forced hidden (contraction) tiling ----------
    # Weights cast/padded ONCE here (outside the hot path); hidden_block=128
    # with H_pad=256 exercises the grid_h=2 accumulator path (the v7x fallback
    # for weights that don't fit 64 MiB VMEM).
    params_bf16 = prepare_server_params(w1, b1, w2, b2, weight_dtype=jnp.bfloat16)
    out_c = server_forward(xb, params_bf16, hidden_block=128)
    jax.block_until_ready(out_c)
    assert out_c.shape == (BB, D_OUT)
    assert jnp.allclose(out_c, ref_mlp(xb), atol=5e-2, rtol=5e-2)

    print("KERNEL_OK")
</pallas_src>

<mosaic_0001>
module attributes {stable_mosaic.version = 11 : i64} {
  func.func @_mlp_kernel(%arg0: i32, %arg1: i32, %arg2: memref<8x32xf32, #tpu.memory_space<vmem>>, %arg3: memref<32x256xf32, #tpu.memory_space<vmem>>, %arg4: memref<1x256xf32, #tpu.memory_space<vmem>>, %arg5: memref<256x128xf32, #tpu.memory_space<vmem>>, %arg6: memref<1x128xf32, #tpu.memory_space<vmem>>, %arg7: memref<8x128xf32, #tpu.memory_space<vmem>>, %arg8: memref<8x128xf32, #tpu.memory_space<vmem>>) attributes {dimension_semantics = [#tpu.dimension_semantics<parallel>, #tpu.dimension_semantics<arbitrary>], iteration_bounds = array<i64: 1, 1>, scalar_prefetch = 0 : i64, scratch_operands = 1 : i64, tpu.core_type = #tpu.core_type<tc>, window_params = [{transform_indices = @transform_0, window_bounds = array<i64: 8, 32>}, {pipeline_mode = #tpu.pipeline_mode<synchronous>, transform_indices = @transform_1, window_bounds = array<i64: 32, 256>}, {pipeline_mode = #tpu.pipeline_mode<synchronous>, transform_indices = @transform_2, window_bounds = array<i64: 1, 256>}, {pipeline_mode = #tpu.pipeline_mode<synchronous>, transform_indices = @transform_3, window_bounds = array<i64: 256, 128>}, {pipeline_mode = #tpu.pipeline_mode<synchronous>, transform_indices = @transform_4, window_bounds = array<i64: 1, 128>}, {transform_indices = @transform_5, window_bounds = array<i64: 8, 128>}]} {
    %c0_i32 = arith.constant 0 : i32
    %0 = arith.cmpi eq, %arg1, %c0_i32 : i32
    %1 = arith.extui %0 : i1 to i32
    %c0_i32_0 = arith.constant 0 : i32
    %2 = arith.cmpi ne, %1, %c0_i32_0 : i32
    scf.if %2 {
      %cst_16 = arith.constant 0.000000e+00 : f32
      %19 = vector.broadcast %cst_16 : f32 to vector<8x128xf32>
      %c0_17 = arith.constant 0 : index
      %c0_18 = arith.constant 0 : index
      %20 = vector.load %arg8[%c0_17, %c0_18] : memref<8x128xf32, #tpu.memory_space<vmem>>, vector<8x128xf32>
      tpu.vector_store %arg8[%c0_17, %c0_18], %19 {strides = array<i32>} : memref<8x128xf32, #tpu.memory_space<vmem>>, vector<8x128xf32>,
    } else {
    }
    %c0 = arith.constant 0 : index
    %c0_1 = arith.constant 0 : index
    %3 = vector.load %arg2[%c0, %c0_1] : memref<8x32xf32, #tpu.memory_space<vmem>>, vector<8x32xf32>
    %c0_2 = arith.constant 0 : index
    %c0_3 = arith.constant 0 : index
    %4 = vector.load %arg3[%c0_2, %c0_3] : memref<32x256xf32, #tpu.memory_space<vmem>>, vector<32x256xf32>
    %cst = arith.constant dense<0.000000e+00> : vector<8x256xf32>
    %5 = tpu.matmul %3, %4, %cst {dimension_numbers = #tpu.dot_dimension_numbers<[1], [0], [0], [1], [0, 0, 1, 1], [], []>} : vector<8x32xf32>, vector<32x256xf32>, vector<8x256xf32> -> vector<8x256xf32>
    %c0_4 = arith.constant 0 : index
    %c0_5 = arith.constant 0 : index
    %6 = vector.load %arg4[%c0_4, %c0_5] : memref<1x256xf32, #tpu.memory_space<vmem>>, vector<1x256xf32>
    %7 = vector.broadcast %6 : vector<1x256xf32> to vector<8x256xf32>
    %8 = arith.addf %5, %7 : vector<8x256xf32>
    %cst_6 = arith.constant 0.000000e+00 : f32
    %9 = vector.broadcast %cst_6 : f32 to vector<8x256xf32>
    %10 = arith.maximumf %8, %9 : vector<8x256xf32>
    %c0_7 = arith.constant 0 : index
    %c0_8 = arith.constant 0 : index
    %11 = vector.load %arg8[%c0_7, %c0_8] : memref<8x128xf32, #tpu.memory_space<vmem>>, vector<8x128xf32>
    %c0_9 = arith.constant 0 : index
    %c0_10 = arith.constant 0 : index
    %12 = vector.load %arg5[%c0_9, %c0_10] : memref<256x128xf32, #tpu.memory_space<vmem>>, vector<256x128xf32>
    %cst_11 = arith.constant dense<0.000000e+00> : vector<8x128xf32>
    %13 = tpu.matmul %10, %12, %cst_11 {dimension_numbers = #tpu.dot_dimension_numbers<[1], [0], [0], [1], [0, 0, 1, 1], [], []>} : vector<8x256xf32>, vector<256x128xf32>, vector<8x128xf32> -> vector<8x128xf32>
    %14 = arith.addf %11, %13 : vector<8x128xf32>
    %c0_12 = arith.constant 0 : index
    %c0_13 = arith.constant 0 : index
    %15 = vector.load %arg8[%c0_12, %c0_13] : memref<8x128xf32, #tpu.memory_space<vmem>>, vector<8x128xf32>
    tpu.vector_store %arg8[%c0_12, %c0_13], %14 {strides = array<i32>} : memref<8x128xf32, #tpu.memory_space<vmem>>, vector<8x128xf32>,
    %c0_i32_14 = arith.constant 0 : i32
    %16 = arith.cmpi eq, %arg1, %c0_i32_14 : i32
    %17 = arith.extui %16 : i1 to i32
    %c0_i32_15 = arith.constant 0 : i32
    %18 = arith.cmpi ne, %17, %c0_i32_15 : i32
    scf.if %18 {
      %c0_16 = arith.constant 0 : index
      %c0_17 = arith.constant 0 : index
      %19 = vector.load %arg8[%c0_16, %c0_17] : memref<8x128xf32, #tpu.memory_space<vmem>>, vector<8x128xf32>
      %c0_18 = arith.constant 0 : index
      %c0_19 = arith.constant 0 : index
      %20 = vector.load %arg6[%c0_18, %c0_19] : memref<1x128xf32, #tpu.memory_space<vmem>>, vector<1x128xf32>
      %21 = vector.broadcast %20 : vector<1x128xf32> to vector<8x128xf32>
      %22 = arith.addf %19, %21 : vector<8x128xf32>
      %c0_20 = arith.constant 0 : index
      %c0_21 = arith.constant 0 : index
      %23 = vector.load %arg7[%c0_20, %c0_21] : memref<8x128xf32, #tpu.memory_space<vmem>>, vector<8x128xf32>
      tpu.vector_store %arg7[%c0_20, %c0_21], %22 {strides = array<i32>} : memref<8x128xf32, #tpu.memory_space<vmem>>, vector<8x128xf32>,
    } else {
    }
    return
  }
  func.func @transform_0(%arg0: i32, %arg1: i32) -> (i32, i32) {
    %c0_i32 = arith.constant 0 : i32
    %c0_i32_0 = arith.constant 0 : i32
    return %arg0, %c0_i32 : i32, i32
  }
  func.func @transform_1(%arg0: i32, %arg1: i32) -> (i32, i32) {
    %c0_i32 = arith.constant 0 : i32
    %c0_i32_0 = arith.constant 0 : i32
    return %c0_i32, %arg1 : i32, i32
  }
  func.func @transform_2(%arg0: i32, %arg1: i32) -> (i32, i32) {
    %c0_i32 = arith.constant 0 : i32
    %c0_i32_0 = arith.constant 0 : i32
    return %c0_i32, %arg1 : i32, i32
  }
  func.func @transform_3(%arg0: i32, %arg1: i32) -> (i32, i32) {
    %c0_i32 = arith.constant 0 : i32
    %c0_i32_0 = arith.constant 0 : i32
    return %arg1, %c0_i32 : i32, i32
  }
  func.func @transform_4(%arg0: i32, %arg1: i32) -> (i32, i32) {
    %c0_i32 = arith.constant 0 : i32
    %c0_i32_0 = arith.constant 0 : i32
    %c0_i32_1 = arith.constant 0 : i32
    return %c0_i32, %c0_i32_0 : i32, i32
  }
  func.func @transform_5(%arg0: i32, %arg1: i32) -> (i32, i32) {
    %c0_i32 = arith.constant 0 : i32
    %c0_i32_0 = arith.constant 0 : i32
    return %arg0, %c0_i32 : i32, i32
  }
}

module attributes {stable_mosaic.version = 11 : i64} {
  func.func @_mlp_kernel(%arg0: i32, %arg1: i32, %arg2: memref<8x32xf32, #tpu.memory_space<vmem>>, %arg3: memref<32x256xf32, #tpu.memory_space<vmem>>, %arg4: memref<1x256xf32, #tpu.memory_space<vmem>>, %arg5: memref<256x128xf32, #tpu.memory_space<vmem>>, %arg6: memref<1x128xf32, #tpu.memory_space<vmem>>, %arg7: memref<8x128xf32, #tpu.memory_space<vmem>>, %arg8: memref<8x128xf32, #tpu.memory_space<vmem>>) attributes {dimension_semantics = [#tpu.dimension_semantics<parallel>, #tpu.dimension_semantics<arbitrary>], iteration_bounds = array<i64: 1, 1>, scalar_prefetch = 0 : i64, scratch_operands = 1 : i64, tpu.core_type = #tpu.core_type<tc>, window_params = [{transform_indices = @transform_0, window_bounds = array<i64: 8, 32>}, {transform_indices = @transform_1, window_bounds = array<i64: 32, 256>}, {transform_indices = @transform_2, window_bounds = array<i64: 1, 256>}, {transform_indices = @transform_3, window_bounds = array<i64: 256, 128>}, {pipeline_mode = #tpu.pipeline_mode<synchronous>, transform_indices = @transform_4, window_bounds = array<i64: 1, 128>}, {transform_indices = @transform_5, window_bounds = array<i64: 8, 128>}]} {
    %c0_i32 = arith.constant 0 : i32
    %0 = arith.cmpi eq, %arg1, %c0_i32 : i32
    %1 = arith.extui %0 : i1 to i32
    %c0_i32_0 = arith.constant 0 : i32
    %2 = arith.cmpi ne, %1, %c0_i32_0 : i32
    scf.if %2 {
      %cst_16 = arith.constant 0.000000e+00 : f32
      %19 = vector.broadcast %cst_16 : f32 to vector<8x128xf32>
      %c0_17 = arith.constant 0 : index
      %c0_18 = arith.constant 0 : index
      %20 = vector.load %arg8[%c0_17, %c0_18] : memref<8x128xf32, #tpu.memory_space<vmem>>, vector<8x128xf32>
      tpu.vector_store %arg8[%c0_17, %c0_18], %19 {strides = array<i32>} : memref<8x128xf32, #tpu.memory_space<vmem>>, vector<8x128xf32>,
    } else {
    }
    %c0 = arith.constant 0 : index
    %c0_1 = arith.constant 0 : index
    %3 = vector.load %arg2[%c0, %c0_1] : memref<8x32xf32, #tpu.memory_space<vmem>>, vector<8x32xf32>
    %c0_2 = arith.constant 0 : index
    %c0_3 = arith.constant 0 : index
    %4 = vector.load %arg3[%c0_2, %c0_3] : memref<32x256xf32, #tpu.memory_space<vmem>>, vector<32x256xf32>
    %cst = arith.constant dense<0.000000e+00> : vector<8x256xf32>
    %5 = tpu.matmul %3, %4, %cst {dimension_numbers = #tpu.dot_dimension_numbers<[1], [0], [0], [1], [0, 0, 1, 1], [], []>} : vector<8x32xf32>, vector<32x256xf32>, vector<8x256xf32> -> vector<8x256xf32>
    %c0_4 = arith.constant 0 : index
    %c0_5 = arith.constant 0 : index
    %6 = vector.load %arg4[%c0_4, %c0_5] : memref<1x256xf32, #tpu.memory_space<vmem>>, vector<1x256xf32>
    %7 = vector.broadcast %6 : vector<1x256xf32> to vector<8x256xf32>
    %8 = arith.addf %5, %7 : vector<8x256xf32>
    %cst_6 = arith.constant 0.000000e+00 : f32
    %9 = vector.broadcast %cst_6 : f32 to vector<8x256xf32>
    %10 = arith.maximumf %8, %9 : vector<8x256xf32>
    %c0_7 = arith.constant 0 : index
    %c0_8 = arith.constant 0 : index
    %11 = vector.load %arg8[%c0_7, %c0_8] : memref<8x128xf32, #tpu.memory_space<vmem>>, vector<8x128xf32>
    %c0_9 = arith.constant 0 : index
    %c0_10 = arith.constant 0 : index
    %12 = vector.load %arg5[%c0_9, %c0_10] : memref<256x128xf32, #tpu.memory_space<vmem>>, vector<256x128xf32>
    %cst_11 = arith.constant dense<0.000000e+00> : vector<8x128xf32>
    %13 = tpu.matmul %10, %12, %cst_11 {dimension_numbers = #tpu.dot_dimension_numbers<[1], [0], [0], [1], [0, 0, 1, 1], [], []>} : vector<8x256xf32>, vector<256x128xf32>, vector<8x128xf32> -> vector<8x128xf32>
    %14 = arith.addf %11, %13 : vector<8x128xf32>
    %c0_12 = arith.constant 0 : index
    %c0_13 = arith.constant 0 : index
    %15 = vector.load %arg8[%c0_12, %c0_13] : memref<8x128xf32, #tpu.memory_space<vmem>>, vector<8x128xf32>
    tpu.vector_store %arg8[%c0_12, %c0_13], %14 {strides = array<i32>} : memref<8x128xf32, #tpu.memory_space<vmem>>, vector<8x128xf32>,
    %c0_i32_14 = arith.constant 0 : i32
    %16 = arith.cmpi eq, %arg1, %c0_i32_14 : i32
    %17 = arith.extui %16 : i1 to i32
    %c0_i32_15 = arith.constant 0 : i32
    %18 = arith.cmpi ne, %17, %c0_i32_15 : i32
    scf.if %18 {
      %c0_16 = arith.constant 0 : index
      %c0_17 = arith.constant 0 : index
      %19 = vector.load %arg8[%c0_16, %c0_17] : memref<8x128xf32, #tpu.memory_space<vmem>>, vector<8x128xf32>
      %c0_18 = arith.constant 0 : index
      %c0_19 = arith.constant 0 : index
      %20 = vector.load %arg6[%c0_18, %c0_19] : memref<1x128xf32, #tpu.memory_space<vmem>>, vector<1x128xf32>
      %21 = vector.broadcast %20 : vector<1x128xf32> to vector<8x128xf32>
      %22 = arith.addf %19, %21 : vector<8x128xf32>
      %c0_20 = arith.constant 0 : index
      %c0_21 = arith.constant 0 : index
      %23 = vector.load %arg7[%c0_20, %c0_21] : memref<8x128xf32, #tpu.memory_space<vmem>>, vector<8x128xf32>
      tpu.vector_store %arg7[%c0_20, %c0_21], %22 {strides = array<i32>} : memref<8x128xf32, #tpu.memory_space<vmem>>, vector<8x128xf32>,
    } else {
    }
    return
  }
  func.func @transform_0(%arg0: i32, %arg1: i32) -> (i32, i32) {
    %c0_i32 = arith.constant 0 : i32
    %c0_i32_0 = arith.constant 0 : i32
    return %arg0, %c0_i32 : i32, i32
  }
  func.func @transform_1(%arg0: i32, %arg1: i32) -> (i32, i32) {
    %c0_i32 = arith.constant 0 : i32
    %c0_i32_0 = arith.constant 0 : i32
    return %c0_i32, %arg1 : i32, i32
  }
  func.func @transform_2(%arg0: i32, %arg1: i32) -> (i32, i32) {
    %c0_i32 = arith.constant 0 : i32
    %c0_i32_0 = arith.constant 0 : i32
    return %c0_i32, %arg1 : i32, i32
  }
  func.func @transform_3(%arg0: i32, %arg1: i32) -> (i32, i32) {
    %c0_i32 = arith.constant 0 : i32
    %c0_i32_0 = arith.constant 0 : i32
    return %arg1, %c0_i32 : i32, i32
  }
  func.func @transform_4(%arg0: i32, %arg1: i32) -> (i32, i32) {
    %c0_i32 = arith.constant 0 : i32
    %c0_i32_0 = arith.constant 0 : i32
    %c0_i32_1 = arith.constant 0 : i32
    return %c0_i32, %c0_i32_0 : i32, i32
  }
  func.func @transform_5(%arg0: i32, %arg1: i32) -> (i32, i32) {
    %c0_i32 = arith.constant 0 : i32
    %c0_i32_0 = arith.constant 0 : i32
    return %arg0, %c0_i32 : i32, i32
  }
}

</mosaic_0001>

<bundles_post_ra>
// kernel: tpu_custom_call.1
= control target key start
LH: loop header
LB: loop body
LE: loop exit
PB: predicated region body
PF: predicated region fallthrough
CT: control target
= control target key end

     0   :  { %10 = vsyncpa [#allocation4], 0  ;;  %s447_s0 = inlined_call_operand.hbm [shape: f32[8,32], index: 0, kind: input, shape index: {}]   ;;  %s448_s1 = inlined_call_operand.hbm [shape: f32[32,256], index: 1, kind: input, shape index: {}]   ;;  %s449_s2 = inlined_call_operand.hbm [shape: f32[1,256], index: 2, kind: input, shape index: {}]   ;;  %s450_s3 = inlined_call_operand.hbm [shape: f32[256,128], index: 3, kind: input, shape index: {}]   ;;  %s451_s4 = inlined_call_operand.vmem [shape: f32[1,128], index: 4, kind: input, shape index: {}]   ;;  %s452_s5 = inlined_call_operand.hbm [shape: f32[8,128], index: 5, kind: output, shape index: {}]  }
   0x1   :  { %11 = vsyncpa [#allocation7], 0 }
   0x2   :  { %12 = vsyncpa [#allocation10], 0  ;;  %s29_s20 = sshll.u32 %s448_s1, 4  ;;  %s30_s20 = int_to_ptr.hbm [resolvable:$true] %s29_s20 }
   0x3   :  { %13 = vsyncpa [#allocation5], 0  ;;  %s390_s21 = smov [#allocation6]   ;;  %s19_s25 = sshll.u32 %s447_s0, 4  ;;  %s20_s25 = int_to_ptr.hbm [resolvable:$true] %s19_s25 }
   0x4   :  { %s31_s22 = sshll.u32 %s390_s21, 4  ;;  %s391_s26 = smov 256   ;;  %s32_s22 = int_to_ptr.vmem [resolvable:$true] %s31_s22 }
   0x5   :  { %s392_s27 = smov 16   ;;  %s393_s28 = smov [#allocation3]  }
   0x6   :  { %37 = dma.hbm_to_vmem [thread:$0]  %s30_s20, 1024, %s32_s22, [#allocation7], %s391_s26, %s391_s26, %s392_s27  }
   0x7   :  { %s21_s29 = sshll.u32 %s393_s28, 4  ;;  %s43_s7 = sshll.u32 %s449_s2, 4  ;;  %s22_s29 = int_to_ptr.vmem [resolvable:$true] %s21_s29  ;;  %s44_s7 = int_to_ptr.hbm [resolvable:$true] %s43_s7 }
   0x8   :  { %24 = dma.hbm_to_vmem [thread:$0]  %s20_s25, 128, %s22_s29, [#allocation4]  }
   0x9   :  { %s53_s9 = sshll.u32 %s450_s3, 4  ;;  %s394_s10 = smov [#allocation8]   ;;  %s54_s9 = int_to_ptr.hbm [resolvable:$true] %s53_s9 }
   0xa   :  { %s45_s11 = sshll.u32 %s394_s10, 4  ;;  %s395_s0 = smov [#allocation9]   ;;  %s46_s11 = int_to_ptr.vmem [resolvable:$true] %s45_s11 }
   0xb   :  { %48 = dma.hbm_to_vmem [thread:$0]  %s44_s7, 32, %s46_s11, [#allocation7]  }
   0xc   :  { %s55_s12 = sshll.u32 %s395_s0, 4  ;;  %s396_s13 = smov 128   ;;  %s56_s12 = int_to_ptr.vmem [resolvable:$true] %s55_s12 }
   0xd   :  { %s397_s14 = smov 8  }
   0xe   :  { %61 = dma.hbm_to_vmem [thread:$0]  %s54_s9, 4096, %s56_s12, [#allocation10], %s396_s13, %s396_s13, %s397_s14  }
   0xf   :  { %382 = dma.done.wait [#allocation4], 128  }
  0x10   :  { %383 = vsyncadd [#allocation4], 4294967168 }
  0x11   :  { %384 = dma.done.wait [#allocation7], 1056  }
  0x12   :  { %385 = vsyncadd [#allocation7], 4294966240 }
  0x13   :  { %386 = dma.done.wait [#allocation10], 4096  }
  0x14   :  { %387 = vsyncadd [#allocation10], 4294963200  ;;  %v92_v0 = vld [vmem:[#allocation6 + $0x30] sm:$0xff]  ;;  %v93_v1 = vld [vmem:[#allocation6 + $0x38] sm:$0xff]  ;;  %vm100_vm0 = vcmask 261120   ;;  %s398_s15 = smov [#allocation11]  }
  0x15   :  { %v90_v2 = vld [vmem:[#allocation6 + $0x20] sm:$0xff]  ;;  %116 = vmatpush.msra.mxu0 %v92_v0  ;;  %136 = vmatpush.msra.mxu1 %v93_v1  ;;  %v91_v3 = vld [vmem:[#allocation6 + $0x28] sm:$0xff]  ;;  %v88_v4 = vld [vmem:[#allocation6 + $0x10] sm:$0xff]  ;;  %s236_s16 = sshll.u32 %s398_s15, 4  ;;  %s238_s19 = sshll.u32 %s452_s5, 4  ;;  %s237_s16 = int_to_ptr.vmem [resolvable:$true] %s236_s16  ;;  %s239_s19 = int_to_ptr.hbm [resolvable:$true] %s238_s19 }
  0x16   :  { %v89_v5 = vld [vmem:[#allocation6 + $0x18] sm:$0xff]  ;;  %v86_v9 = vld [vmem:[#allocation6] sm:$0xff]  ;;  %v87_v10 = vld [vmem:[#allocation6 + $0x8] sm:$0xff] }
  0x17   :  { %117 = vmatpush.msra.mxu0 %v90_v2  ;;  %137 = vmatpush.msra.mxu1 %v91_v3  ;;  %v162_v6 = vld [vmem:[#allocation9 + $0x78] sm:$0xff]  ;;  %v161_v8 = vld [vmem:[#allocation9 + $0x70] sm:$0xff]  ;;  %v160_v13 = vld [vmem:[#allocation9 + $0x68] sm:$0xff] }
  0x18   :  { %v178_v7 = vld [vmem:[#allocation9 + $0xf8] sm:$0xff]  ;;  %179 = vmatpush.msra.mxu2 %v162_v6  ;;  %v177_v11 = vld [vmem:[#allocation9 + $0xf0] sm:$0xff]  ;;  %v176_v14 = vld [vmem:[#allocation9 + $0xe8] sm:$0xff] }
  0x19   :  { %199 = vmatpush.msra.mxu3 %v178_v7  ;;  %118 = vmatpush.msra.mxu0 %v88_v4  ;;  %v85_v12 = vld [vmem:[#allocation3] sm:$0xff]  ;;  %v159_v15 = vld [vmem:[#allocation9 + $0x60] sm:$0xff]  ;;  %v156_v21 = vld [vmem:[#allocation9 + $0x48] sm:$0xff] }
  0x1a   :  { %138 = vmatpush.msra.mxu1 %v89_v5  ;;  %180 = vmatpush.msra.mxu2 %v161_v8  ;;  %v175_v16 = vld [vmem:[#allocation9 + $0xe0] sm:$0xff]  ;;  %v158_v17 = vld [vmem:[#allocation9 + $0x58] sm:$0xff]  ;;  %v157_v19 = vld [vmem:[#allocation9 + $0x50] sm:$0xff] }
  0x1b   :  { %200 = vmatpush.msra.mxu3 %v177_v11  ;;  %119 = vmatpush.msra.mxu0 %v86_v9  ;;  %v174_v18 = vld [vmem:[#allocation9 + $0xd8] sm:$0xff]  ;;  %v173_v20 = vld [vmem:[#allocation9 + $0xd0] sm:$0xff]  ;;  %v172_v22 = vld [vmem:[#allocation9 + $0xc8] sm:$0xff] }
  0x1c   :  { %139 = vmatpush.msra.mxu1 %v87_v10  ;;  %250 = vmatmul.msk.f32.vlgmr.msra.gmra.mxu0 %vm100_vm0, %v85_v12  ;;  %v155_v23 = vld [vmem:[#allocation9 + $0x40] sm:$0xff]  ;;  %v154_v25 = vld [vmem:[#allocation9 + $0x38] sm:$0xff]  ;;  %v153_v27 = vld [vmem:[#allocation9 + $0x30] sm:$0xff] }
  0x1d   :  { %251 = vmatmul.msk.f32.vlgmr.msra.gmra.mxu1 %vm100_vm0, %v85_v12  ;;  %181 = vmatpush.msra.mxu2 %v160_v13  ;;  %v171_v24 = vld [vmem:[#allocation9 + $0xc0] sm:$0xff]  ;;  %v170_v26 = vld [vmem:[#allocation9 + $0xb8] sm:$0xff]  ;;  %v169_v28 = vld [vmem:[#allocation9 + $0xb0] sm:$0xff] }
  0x1e   :  { %201 = vmatpush.msra.mxu3 %v176_v14  ;;  %v152_v29 = vld [vmem:[#allocation9 + $0x28] sm:$0xff]  ;;  %v151_v31 = vld [vmem:[#allocation9 + $0x20] sm:$0xff]  ;;  %v150_v33 = vld [vmem:[#allocation9 + $0x18] sm:$0xff] }
  0x1f   :  { %182 = vmatpush.msra.mxu2 %v159_v15  ;;  %v168_v30 = vld [vmem:[#allocation9 + $0xa8] sm:$0xff]  ;;  %v167_v32 = vld [vmem:[#allocation9 + $0xa0] sm:$0xff]  ;;  %v166_v34 = vld [vmem:[#allocation9 + $0x98] sm:$0xff] }
  0x20   :  { %202 = vmatpush.msra.mxu3 %v175_v16  ;;  %v149_v35 = vld [vmem:[#allocation9 + $0x10] sm:$0xff]  ;;  %v148_v37 = vld [vmem:[#allocation9 + $0x8] sm:$0xff]  ;;  %v147_v39 = vld [vmem:[#allocation9] sm:$0xff] }
  0x21   :  { %183 = vmatpush.msra.mxu2 %v158_v17  ;;  %v165_v36 = vld [vmem:[#allocation9 + $0x90] sm:$0xff]  ;;  %v164_v38 = vld [vmem:[#allocation9 + $0x88] sm:$0xff]  ;;  %v163_v40 = vld [vmem:[#allocation9 + $0x80] sm:$0xff] }
  0x22   :  { %203 = vmatpush.msra.mxu3 %v174_v18  ;;  %v94_v41 = vld [vmem:[#allocation8] sm:$0x3]  ;;  %v261_v50 = vld [vmem:[%s451_s4] ss:$0 sm:$0xff] }
  0x23   :  { %184 = vmatpush.msra.mxu2 %v157_v19  ;;  %v96_v42 = vperm.slane %v94_v41, 0  ;;  %v97_v43 = vperm.slane %v94_v41, 1 }
  0x24   :  { %204 = vmatpush.msra.mxu3 %v173_v20 }
  0x25   :  { %185 = vmatpush.msra.mxu2 %v156_v21 }
  0x26   :  { %205 = vmatpush.msra.mxu3 %v172_v22 }
  0x27   :  { %186 = vmatpush.msra.mxu2 %v155_v23 }
  0x28   :  { %206 = vmatpush.msra.mxu3 %v171_v24 }
  0x29   :  { %187 = vmatpush.msra.mxu2 %v154_v25 }
  0x2a   :  { %207 = vmatpush.msra.mxu3 %v170_v26 }
  0x2b   :  { %188 = vmatpush.msra.mxu2 %v153_v27 }
  0x2c   :  { %208 = vmatpush.msra.mxu3 %v169_v28 }
  0x2d   :  { %189 = vmatpush.msra.mxu2 %v152_v29 }
  0x2e   :  { %209 = vmatpush.msra.mxu3 %v168_v30 }
  0x2f   :  { %190 = vmatpush.msra.mxu2 %v151_v31 }
  0x30   :  { %210 = vmatpush.msra.mxu3 %v167_v32 }
  0x31   :  { %191 = vmatpush.msra.mxu2 %v150_v33 }
  0x32   :  { %211 = vmatpush.msra.mxu3 %v166_v34 }
  0x33   :  { %192 = vmatpush.msra.mxu2 %v149_v35 }
  0x34   :  { %212 = vmatpush.msra.mxu3 %v165_v36 }
  0x35   :  { %193 = vmatpush.msra.mxu2 %v148_v37 }
  0x36   :  { %213 = vmatpush.msra.mxu3 %v164_v38 }
  0x37   :  { %194 = vmatpush.msra.mxu2 %v147_v39 }
  0x38   :  { %214 = vmatpush.msra.mxu3 %v163_v40 }
  0x99   :  { %v121_v44 = vpop.f32.mrf.mxu0 }
  0x9a   :  { %v141_v45 = vpop.f32.mrf.mxu1  ;;  %v122_v46 = vadd.f32 %v121_v44, %v96_v42 }
  0x9b   :  { %v142_v47 = vadd.f32 %v141_v45, %v97_v43 }
  0x9c   :  { %v144_v48 = vmax.f32 %v122_v46, 0.0 }
  0x9d   :  { %v145_v49 = vmax.f32 %v142_v47, 0.0 }
  0x9e   :  { %195 = vmatmul.f32.vlgmr.msra.gmra.mxu2 %v144_v48 }
  0x9f   :  { %215 = vmatmul.f32.vlgmr.msra.gmra.mxu3 %v145_v49 }
 0x121   :  { %v196_v51 = vpop.f32.mrf.mxu2 }
 0x122   :  { %v216_v52 = vpop.f32.mrf.mxu3 }
 0x123   :  { %v217_v53 = vadd.f32 %v216_v52, %v196_v51 }
 0x125   :  { %v229_v54 = vadd.f32 %v261_v50, %v217_v53 }
 0x127   :  { %230 = vst [vmem:[#allocation11] sm:$0xff] %v229_v54 }
 0x128   :  { %241 = dma.vmem_to_hbm [thread:$0]  %s237_s16, 128, %s239_s19, [#allocation5]  }
 0x129   :  { %388 = dma.done.wait [#allocation5], 128  }
 0x12a   :  { %389 = vsyncadd [#allocation5], 4294967168 }
 0x12b   :  { %246 = vsyncpa [#allocation4], 1 }
 0x12c   :  { %247 = vsyncpa [#allocation7], 1 }
 0x12d   :  { %248 = vsyncpa [#allocation10], 1 }
 0x12e   :  { %249 = vsyncpa [#allocation5], 1 }

// kernel: tpu_custom_call.1
= control target key start
LH: loop header
LB: loop body
LE: loop exit
PB: predicated region body
PF: predicated region fallthrough
CT: control target
= control target key end

     0   :  { %10 = vsyncpa [#allocation4], 0  ;;  %s447_s0 = inlined_call_operand.hbm [shape: f32[8,32], index: 0, kind: input, shape index: {}]   ;;  %s448_s1 = inlined_call_operand.hbm [shape: f32[32,256], index: 1, kind: input, shape index: {}]   ;;  %s449_s2 = inlined_call_operand.hbm [shape: f32[1,256], index: 2, kind: input, shape index: {}]   ;;  %s450_s3 = inlined_call_operand.hbm [shape: f32[256,128], index: 3, kind: input, shape index: {}]   ;;  %s451_s4 = inlined_call_operand.vmem [shape: f32[1,128], index: 4, kind: input, shape index: {}]   ;;  %s452_s5 = inlined_call_operand.hbm [shape: f32[8,128], index: 5, kind: output, shape index: {}]  }
   0x1   :  { %11 = vsyncpa [#allocation7], 0 }
   0x2   :  { %12 = vsyncpa [#allocation10], 0  ;;  %s29_s20 = sshll.u32 %s448_s1, 4  ;;  %s30_s20 = int_to_ptr.hbm [resolvable:$true] %s29_s20 }
   0x3   :  { %13 = vsyncpa [#allocation5], 0  ;;  %s390_s21 = smov [#allocation6]   ;;  %s19_s25 = sshll.u32 %s447_s0, 4  ;;  %s20_s25 = int_to_ptr.hbm [resolvable:$true] %s19_s25 }
   0x4   :  { %s31_s22 = sshll.u32 %s390_s21, 4  ;;  %s391_s26 = smov 256   ;;  %s32_s22 = int_to_ptr.vmem [resolvable:$true] %s31_s22 }
   0x5   :  { %s392_s27 = smov 16   ;;  %s393_s28 = smov [#allocation3]  }
   0x6   :  { %37 = dma.hbm_to_vmem [thread:$0]  %s30_s20, 1024, %s32_s22, [#allocation7], %s391_s26, %s391_s26, %s392_s27  }
   0x7   :  { %s21_s29 = sshll.u32 %s393_s28, 4  ;;  %s43_s7 = sshll.u32 %s449_s2, 4  ;;  %s22_s29 = int_to_ptr.vmem [resolvable:$true] %s21_s29  ;;  %s44_s7 = int_to_ptr.hbm [resolvable:$true] %s43_s7 }
   0x8   :  { %24 = dma.hbm_to_vmem [thread:$0]  %s20_s25, 128, %s22_s29, [#allocation4]  }
   0x9   :  { %s53_s9 = sshll.u32 %s450_s3, 4  ;;  %s394_s10 = smov [#allocation8]   ;;  %s54_s9 = int_to_ptr.hbm [resolvable:$true] %s53_s9 }
   0xa   :  { %s45_s11 = sshll.u32 %s394_s10, 4  ;;  %s395_s0 = smov [#allocation9]   ;;  %s46_s11 = int_to_ptr.vmem [resolvable:$true] %s45_s11 }
   0xb   :  { %48 = dma.hbm_to_vmem [thread:$0]  %s44_s7, 32, %s46_s11, [#allocation7]  }
   0xc   :  { %s55_s12 = sshll.u32 %s395_s0, 4  ;;  %s396_s13 = smov 128   ;;  %s56_s12 = int_to_ptr.vmem [resolvable:$true] %s55_s12 }
   0xd   :  { %s397_s14 = smov 8  }
   0xe   :  { %61 = dma.hbm_to_vmem [thread:$0]  %s54_s9, 4096, %s56_s12, [#allocation10], %s396_s13, %s396_s13, %s397_s14  }
   0xf   :  { %382 = dma.done.wait [#allocation4], 128  }
  0x10   :  { %383 = vsyncadd [#allocation4], 4294967168 }
  0x11   :  { %384 = dma.done.wait [#allocation7], 1056  }
  0x12   :  { %385 = vsyncadd [#allocation7], 4294966240 }
  0x13   :  { %386 = dma.done.wait [#allocation10], 4096  }
  0x14   :  { %387 = vsyncadd [#allocation10], 4294963200  ;;  %v92_v0 = vld [vmem:[#allocation6 + $0x30] sm:$0xff]  ;;  %v93_v1 = vld [vmem:[#allocation6 + $0x38] sm:$0xff]  ;;  %vm100_vm0 = vcmask 261120   ;;  %s398_s15 = smov [#allocation11]  }
  0x15   :  { %v90_v2 = vld [vmem:[#allocation6 + $0x20] sm:$0xff]  ;;  %116 = vmatpush.msra.mxu0 %v92_v0  ;;  %136 = vmatpush.msra.mxu1 %v93_v1  ;;  %v91_v3 = vld [vmem:[#allocation6 + $0x28] sm:$0xff]  ;;  %v88_v4 = vld [vmem:[#allocation6 + $0x10] sm:$0xff]  ;;  %s236_s16 = sshll.u32 %s398_s15, 4  ;;  %s238_s19 = sshll.u32 %s452_s5, 4  ;;  %s237_s16 = int_to_ptr.vmem [resolvable:$true] %s236_s16  ;;  %s239_s19 = int_to_ptr.hbm [resolvable:$true] %s238_s19 }
  0x16   :  { %v89_v5 = vld [vmem:[#allocation6 + $0x18] sm:$0xff]  ;;  %v86_v9 = vld [vmem:[#allocation6] sm:$0xff]  ;;  %v87_v10 = vld [vmem:[#allocation6 + $0x8] sm:$0xff] }
  0x17   :  { %117 = vmatpush.msra.mxu0 %v90_v2  ;;  %137 = vmatpush.msra.mxu1 %v91_v3  ;;  %v162_v6 = vld [vmem:[#allocation9 + $0x78] sm:$0xff]  ;;  %v161_v8 = vld [vmem:[#allocation9 + $0x70] sm:$0xff]  ;;  %v160_v13 = vld [vmem:[#allocation9 + $0x68] sm:$0xff] }
  0x18   :  { %v178_v7 = vld [vmem:[#allocation9 + $0xf8] sm:$0xff]  ;;  %179 = vmatpush.msra.mxu2 %v162_v6  ;;  %v177_v11 = vld [vmem:[#allocation9 + $0xf0] sm:$0xff]  ;;  %v176_v14 = vld [vmem:[#allocation9 + $0xe8] sm:$0xff] }
  0x19   :  { %199 = vmatpush.msra.mxu3 %v178_v7  ;;  %118 = vmatpush.msra.mxu0 %v88_v4  ;;  %v85_v12 = vld [vmem:[#allocation3] sm:$0xff]  ;;  %v159_v15 = vld [vmem:[#allocation9 + $0x60] sm:$0xff]  ;;  %v156_v21 = vld [vmem:[#allocation9 + $0x48] sm:$0xff] }
  0x1a   :  { %138 = vmatpush.msra.mxu1 %v89_v5  ;;  %180 = vmatpush.msra.mxu2 %v161_v8  ;;  %v175_v16 = vld [vmem:[#allocation9 + $0xe0] sm:$0xff]  ;;  %v158_v17 = vld [vmem:[#allocation9 + $0x58] sm:$0xff]  ;;  %v157_v19 = vld [vmem:[#allocation9 + $0x50] sm:$0xff] }
  0x1b   :  { %200 = vmatpush.msra.mxu3 %v177_v11  ;;  %119 = vmatpush.msra.mxu0 %v86_v9  ;;  %v174_v18 = vld [vmem:[#allocation9 + $0xd8] sm:$0xff]  ;;  %v173_v20 = vld [vmem:[#allocation9 + $0xd0] sm:$0xff]  ;;  %v172_v22 = vld [vmem:[#allocation9 + $0xc8] sm:$0xff] }
  0x1c   :  { %139 = vmatpush.msra.mxu1 %v87_v10  ;;  %250 = vmatmul.msk.f32.vlgmr.msra.gmra.mxu0 %vm100_vm0, %v85_v12  ;;  %v155_v23 = vld [vmem:[#allocation9 + $0x40] sm:$0xff]  ;;  %v154_v25 = vld [vmem:[#allocation9 + $0x38] sm:$0xff]  ;;  %v153_v27 = vld [vmem:[#allocation9 + $0x30] sm:$0xff] }
  0x1d   :  { %251 = vmatmul.msk.f32.vlgmr.msra.gmra.mxu1 %vm100_vm0, %v85_v12  ;;  %181 = vmatpush.msra.mxu2 %v160_v13  ;;  %v171_v24 = vld [vmem:[#allocation9 + $0xc0] sm:$0xff]  ;;  %v170_v26 = vld [vmem:[#allocation9 + $0xb8] sm:$0xff]  ;;  %v169_v28 = vld [vmem:[#allocation9 + $0xb0] sm:$0xff] }
  0x1e   :  { %201 = vmatpush.msra.mxu3 %v176_v14  ;;  %v152_v29 = vld [vmem:[#allocation9 + $0x28] sm:$0xff]  ;;  %v151_v31 = vld [vmem:[#allocation9 + $0x20] sm:$0xff]  ;;  %v150_v33 = vld [vmem:[#allocation9 + $0x18] sm:$0xff] }
  0x1f   :  { %182 = vmatpush.msra.mxu2 %v159_v15  ;;  %v168_v30 = vld [vmem:[#allocation9 + $0xa8] sm:$0xff]  ;;  %v167_v32 = vld [vmem:[#allocation9 + $0xa0] sm:$0xff]  ;;  %v166_v34 = vld [vmem:[#allocation9 + $0x98] sm:$0xff] }
  0x20   :  { %202 = vmatpush.msra.mxu3 %v175_v16  ;;  %v149_v35 = vld [vmem:[#allocation9 + $0x10] sm:$0xff]  ;;  %v148_v37 = vld [vmem:[#allocation9 + $0x8] sm:$0xff]  ;;  %v147_v39 = vld [vmem:[#allocation9] sm:$0xff] }
  0x21   :  { %183 = vmatpush.msra.mxu2 %v158_v17  ;;  %v165_v36 = vld [vmem:[#allocation9 + $0x90] sm:$0xff]  ;;  %v164_v38 = vld [vmem:[#allocation9 + $0x88] sm:$0xff]  ;;  %v163_v40 = vld [vmem:[#allocation9 + $0x80] sm:$0xff] }
  0x22   :  { %203 = vmatpush.msra.mxu3 %v174_v18  ;;  %v94_v41 = vld [vmem:[#allocation8] sm:$0x3]  ;;  %v261_v50 = vld [vmem:[%s451_s4] ss:$0 sm:$0xff] }
  0x23   :  { %184 = vmatpush.msra.mxu2 %v157_v19  ;;  %v96_v42 = vperm.slane %v94_v41, 0  ;;  %v97_v43 = vperm.slane %v94_v41, 1 }
  0x24   :  { %204 = vmatpush.msra.mxu3 %v173_v20 }
  0x25   :  { %185 = vmatpush.msra.mxu2 %v156_v21 }
  0x26   :  { %205 = vmatpush.msra.mxu3 %v172_v22 }
  0x27   :  { %186 = vmatpush.msra.mxu2 %v155_v23 }
  0x28   :  { %206 = vmatpush.msra.mxu3 %v171_v24 }
  0x29   :  { %187 = vmatpush.msra.mxu2 %v154_v25 }
  0x2a   :  { %207 = vmatpush.msra.mxu3 %v170_v26 }
  0x2b   :  { %188 = vmatpush.msra.mxu2 %v153_v27 }
  0x2c   :  { %208 = vmatpush.msra.mxu3 %v169_v28 }
  0x2d   :  { %189 = vmatpush.msra.mxu2 %v152_v29 }
  0x2e   :  { %209 = vmatpush.msra.mxu3 %v168_v30 }
  0x2f   :  { %190 = vmatpush.msra.mxu2 %v151_v31 }
  0x30   :  { %210 = vmatpush.msra.mxu3 %v167_v32 }
  0x31   :  { %191 = vmatpush.msra.mxu2 %v150_v33 }
  0x32   :  { %211 = vmatpush.msra.mxu3 %v166_v34 }
  0x33   :  { %192 = vmatpush.msra.mxu2 %v149_v35 }
  0x34   :  { %212 = vmatpush.msra.mxu3 %v165_v36 }
  0x35   :  { %193 = vmatpush.msra.mxu2 %v148_v37 }
  0x36   :  { %213 = vmatpush.msra.mxu3 %v164_v38 }
  0x37   :  { %194 = vmatpush.msra.mxu2 %v147_v39 }
  0x38   :  { %214 = vmatpush.msra.mxu3 %v163_v40 }
  0x99   :  { %v121_v44 = vpop.f32.mrf.mxu0 }
  0x9a   :  { %v141_v45 = vpop.f32.mrf.mxu1  ;;  %v122_v46 = vadd.f32 %v121_v44, %v96_v42 }
  0x9b   :  { %v142_v47 = vadd.f32 %v141_v45, %v97_v43 }
  0x9c   :  { %v144_v48 = vmax.f32 %v122_v46, 0.0 }
  0x9d   :  { %v145_v49 = vmax.f32 %v142_v47, 0.0 }
  0x9e   :  { %195 = vmatmul.f32.vlgmr.msra.gmra.mxu2 %v144_v48 }
  0x9f   :  { %215 = vmatmul.f32.vlgmr.msra.gmra.mxu3 %v145_v49 }
 0x121   :  { %v196_v51 = vpop.f32.mrf.mxu2 }
 0x122   :  { %v216_v52 = vpop.f32.mrf.mxu3 }
 0x123   :  { %v217_v53 = vadd.f32 %v216_v52, %v196_v51 }
 0x125   :  { %v229_v54 = vadd.f32 %v261_v50, %v217_v53 }
 0x127   :  { %230 = vst [vmem:[#allocation11] sm:$0xff] %v229_v54 }
 0x128   :  { %241 = dma.vmem_to_hbm [thread:$0]  %s237_s16, 128, %s239_s19, [#allocation5]  }
 0x129   :  { %388 = dma.done.wait [#allocation5], 128  }
 0x12a   :  { %389 = vsyncadd [#allocation5], 4294967168 }
 0x12b   :  { %246 = vsyncpa [#allocation4], 1 }
 0x12c   :  { %247 = vsyncpa [#allocation7], 1 }
 0x12d   :  { %248 = vsyncpa [#allocation10], 1 }
 0x12e   :  { %249 = vsyncpa [#allocation5], 1 }

</bundles_post_ra>
